<compile_context>
chip_gen: v7x
topology: tpu7x:2x2x1
jax: 0.10.0
libtpu: 0.0.40
codegen_flags: <defaults>
</compile_context>

<pallas_src>
import jax
import jax.numpy as jnp
from jax.experimental import pallas as pl
from jax.experimental.pallas import tpu as pltpu


def _round_up(x, m):
    return -(-x // m) * m


def _spectral_matmul_kernel(xr_ref, xi_ref, wr_ref, wi_ref, or_ref, oi_ref):
    """Per-mode complex channel contraction on the MXU.

    xr/xi: (tm, B, Cin) bf16   wr/wi: (tm, Cin, Cout) bf16
    out:   (tm, B, Cout) f32   (f32 accumulation on the MXU)
    """
    xr = xr_ref[...]
    xi = xi_ref[...]
    wr = wr_ref[...]
    wi = wi_ref[...]

    # Gauss 3-multiplication complex matmul, ordered to minimise the number
    # of simultaneously-live f32 temporaries:
    #   t1 = (xr + xi) @ wr
    #   t3 = xi @ (wr + wi)      -> real part written, t3 / (wr+wi) dead
    #   t2 = xr @ (wi - wr)      -> imag part written
    t1 = jnp.einsum('mbi,mio->mbo', xr + xi, wr,
                    preferred_element_type=jnp.float32)
    t3 = jnp.einsum('mbi,mio->mbo', xi, wr + wi,
                    preferred_element_type=jnp.float32)
    or_ref[...] = t1 - t3
    t2 = jnp.einsum('mbi,mio->mbo', xr, wi - wr,
                    preferred_element_type=jnp.float32)
    oi_ref[...] = t1 + t2


def _vmem_budget():
    """Chip-aware (block budget, vmem_limit_bytes)."""
    try:
        cap = getattr(pltpu.get_tpu_info(), "vmem_capacity_bytes", None)
    except Exception:
        cap = None
    if cap is None:
        cap = 64 << 20            # unknown -> assume the smallest (v7x-class)
    if cap <= (64 << 20):         # v7x: 64 MiB physical per TensorCore
        return 18 << 20, 48 << 20
    return 44 << 20, 96 << 20     # v5e / v6e: 128 MiB physical


def _pick_mode_block(M, B, Cin, Cout, budget_bytes):
    """Max modes per block whose *real* VMEM footprint fits the budget.

    Footprint = (8,128)-tile-padded, double-buffered x/w/out blocks plus the
    live in-kernel temporaries (one x-sum, two w-sums, up to three f32 acc).
    """
    b_in = _round_up(B, 16)            # bf16 sublane packing (x blocks)
    b_out = _round_up(B, 8)            # f32 sublanes        (out blocks)
    ci_s = _round_up(Cin, 16)          # bf16 sublanes       (w blocks)
    ci_l = _round_up(Cin, 128)         # lanes
    co_l = _round_up(Cout, 128)

    x_blk = b_in * ci_l * 2            # bf16
    w_blk = ci_s * co_l * 2            # bf16
    o_blk = b_out * co_l * 4           # f32

    pipelined = 2 * (2 * x_blk + 2 * w_blk + 2 * o_blk)   # double-buffered I/O
    temps = 2 * x_blk + 2 * w_blk + 3 * o_blk             # live temporaries
    per_mode = pipelined + temps

    return max(1, min(M, budget_bytes // per_mode))


def _compl_mul_modes_pallas(xr, xi, wr, wi):
    """xr/xi: (M, B, Cin) bf16, wr/wi: (M, Cin, Cout) bf16 -> (M, B, Cout) f32 x2."""
    M, B, Cin = xr.shape
    Cout = wr.shape[2]

    budget, vmem_limit = _vmem_budget()

    # Pad the batch axis to a sublane multiple (MXU rows / output stores).
    # NOTE: for lane density the caller should also keep Cin/Cout at (or pad
    # them to) a multiple of 128 when the model width is close to one; blind
    # channel padding is NOT done here because it inflates HBM traffic on
    # this bandwidth-bound kernel.
    Bp = _round_up(B, 8)
    if Bp != B:
        padb = ((0, 0), (0, Bp - B), (0, 0))
        xr = jnp.pad(xr, padb)
        xi = jnp.pad(xi, padb)

    # Schedule: even number of equal mode-blocks (>= 2) so the 'parallel'
    # grid shards cleanly across v7x's two TensorCores; pad M with zero modes.
    tm_cap = _pick_mode_block(M, Bp, Cin, Cout, budget)
    g = max(pl.cdiv(M, tm_cap), 2)
    if g % 2:
        g += 1
    tm = pl.cdiv(M, g)
    Mp = g * tm
    if Mp != M:
        padm = ((0, Mp - M), (0, 0), (0, 0))
        xr = jnp.pad(xr, padm)
        xi = jnp.pad(xi, padm)
        wr = jnp.pad(wr, padm)
        wi = jnp.pad(wi, padm)

    # Last two dims of every block equal the full array dims, so the (8,128)
    # divisibility rule is satisfied for any B / Cin / Cout.
    x_spec = pl.BlockSpec((tm, Bp, Cin), lambda m: (m, 0, 0))
    w_spec = pl.BlockSpec((tm, Cin, Cout), lambda m: (m, 0, 0))
    o_spec = pl.BlockSpec((tm, Bp, Cout), lambda m: (m, 0, 0))

    out_r, out_i = pl.pallas_call(
        _spectral_matmul_kernel,
        grid=(g,),
        in_specs=[x_spec, x_spec, w_spec, w_spec],
        out_specs=(o_spec, o_spec),
        out_shape=(
            jax.ShapeDtypeStruct((Mp, Bp, Cout), jnp.float32),
            jax.ShapeDtypeStruct((Mp, Bp, Cout), jnp.float32),
        ),
        compiler_params=pltpu.CompilerParams(
            dimension_semantics=("parallel",),
            vmem_limit_bytes=vmem_limit),
    )(xr, xi, wr, wi)

    return out_r[:M, :B], out_i[:M, :B]


def fuse_spectral_weights(w1r, w1i, w2r, w2i):
    """One-time weight preparation (hoisted out of the forward pass).

    (Cin, Cout, modes1, modes2) x4 f32  ->  (M, Cin, Cout) bf16 real & imag,
    with the low- and high-frequency blocks fused along the mode axis.
    """
    Cin, Cout, m1, m2 = w1r.shape

    def lay(a, b):
        w = jnp.concatenate([a, b], axis=2)              # (Cin,Cout,2*m1,m2)
        w = jnp.transpose(w, (2, 3, 0, 1)).reshape(2 * m1 * m2, Cin, Cout)
        return w.astype(jnp.bfloat16)

    return lay(w1r, w2r), lay(w1i, w2i)


def spectral_conv2d(x, wr_fused, wi_fused, modes1, modes2):
    """Forward pass of SpectralConv2d.

    x: (B, Cin, H, W) f32 (NCHW).  wr_fused/wi_fused: output of
    fuse_spectral_weights, shape (2*modes1*modes2, Cin, Cout) bf16.
    """
    B, Cin, H, W = x.shape
    M, Cin_w, Cout = wr_fused.shape
    assert Cin_w == Cin and M == 2 * modes1 * modes2
    Wf = W // 2 + 1
    assert H >= 2 * modes1 and Wf >= modes2

    # TODO(synk): no Pallas FFT primitive; rfft2/irfft2 run via XLA (jnp.fft).
    x_ft = jnp.fft.rfft2(x)                              # (B, Cin, H, Wf) c64

    # Fuse low/high frequency blocks, flatten modes to the leading axis,
    # channels last (lane axis).
    x_modes = jnp.concatenate(
        [x_ft[:, :, :modes1, :modes2], x_ft[:, :, H - modes1:, :modes2]],
        axis=2)                                          # (B, Cin, 2*m1, m2)
    x_modes = jnp.transpose(x_modes, (2, 3, 0, 1)).reshape(M, B, Cin)
    xr = jnp.real(x_modes).astype(jnp.bfloat16)
    xi = jnp.imag(x_modes).astype(jnp.bfloat16)

    out_r, out_i = _compl_mul_modes_pallas(xr, xi, wr_fused, wi_fused)

    # Back to (B, Cout, 2*m1, m2) and assemble the padded spectral tensor.
    out = (out_r + 1j * out_i).reshape(2 * modes1, modes2, B, Cout)
    out = jnp.transpose(out, (2, 3, 0, 1))               # (B, Cout, 2*m1, m2)
    zeros_mid = jnp.zeros((B, Cout, H - 2 * modes1, modes2), out.dtype)
    out_ft = jnp.concatenate(
        [out[:, :, :modes1], zeros_mid, out[:, :, modes1:]], axis=2)
    out_ft = jnp.pad(out_ft, ((0, 0), (0, 0), (0, 0), (0, Wf - modes2)))

    return jnp.fft.irfft2(out_ft, s=(H, W))              # (B, Cout, H, W) f32


def _reference(x, w1r, w1i, w2r, w2i, modes1, modes2):
    """Pure-JAX f32 reference mirroring the PyTorch module (verification)."""
    B, Cin, H, W = x.shape
    Cout = w1r.shape[1]
    Wf = W // 2 + 1
    w1 = w1r + 1j * w1i
    w2 = w2r + 1j * w2i
    x_ft = jnp.fft.rfft2(x)
    out_ft = jnp.zeros((B, Cout, H, Wf), jnp.complex64)
    out_ft = out_ft.at[:, :, :modes1, :modes2].set(
        jnp.einsum('bixy,ioxy->boxy', x_ft[:, :, :modes1, :modes2], w1))
    out_ft = out_ft.at[:, :, H - modes1:, :modes2].set(
        jnp.einsum('bixy,ioxy->boxy', x_ft[:, :, H - modes1:, :modes2], w2))
    return jnp.fft.irfft2(out_ft, s=(H, W))


if __name__ == "__main__":
    # Small shapes consistent with the module (perf is meaningless here —
    # benchmark at production FNO widths where channels approach 128).
    B, Cin, Cout, H, W = 2, 4, 4, 16, 16
    modes1, modes2 = 4, 4

    key = jax.random.PRNGKey(0)
    kx, k1r, k1i, k2r, k2i = jax.random.split(key, 5)

    x = jax.random.normal(kx, (B, Cin, H, W), dtype=jnp.float32)

    # Parameter init: scale * uniform[0,1) for real and imaginary parts,
    # matching `scale * torch.rand(..., dtype=torch.cfloat)`.
    scale = 1.0 / (Cin * Cout)
    wshape = (Cin, Cout, modes1, modes2)
    w1r = scale * jax.random.uniform(k1r, wshape, dtype=jnp.float32)
    w1i = scale * jax.random.uniform(k1i, wshape, dtype=jnp.float32)
    w2r = scale * jax.random.uniform(k2r, wshape, dtype=jnp.float32)
    w2i = scale * jax.random.uniform(k2i, wshape, dtype=jnp.float32)

    # Weight fusion/layout (+ bf16 cast) done once, outside the forward pass.
    wr_fused, wi_fused = fuse_spectral_weights(w1r, w1i, w2r, w2i)

    out = spectral_conv2d(x, wr_fused, wi_fused, modes1, modes2)
    out = jax.block_until_ready(out)

    ref = jax.block_until_ready(
        _reference(x, w1r, w1i, w2r, w2i, modes1, modes2))
    assert out.shape == (B, Cout, H, W)
    # bf16 kernel inputs with f32 accumulation: tolerance loosened vs. pure f32.
    assert jnp.allclose(out, ref, atol=2e-2, rtol=2e-2)

    print("KERNEL_OK")
</pallas_src>

<mosaic_0001>
module attributes {stable_mosaic.version = 11 : i64} {
  func.func @_spectral_matmul_kernel(%arg0: i32, %arg1: memref<16x8x4xbf16, #tpu.memory_space<vmem>>, %arg2: memref<16x8x4xbf16, #tpu.memory_space<vmem>>, %arg3: memref<16x4x4xbf16, #tpu.memory_space<vmem>>, %arg4: memref<16x4x4xbf16, #tpu.memory_space<vmem>>, %arg5: memref<16x8x4xf32, #tpu.memory_space<vmem>>, %arg6: memref<16x8x4xf32, #tpu.memory_space<vmem>>) attributes {dimension_semantics = [#tpu.dimension_semantics<parallel>], iteration_bounds = array<i64: 2>, scalar_prefetch = 0 : i64, scratch_operands = 0 : i64, tpu.core_type = #tpu.core_type<tc>, window_params = [{transform_indices = @transform_0, window_bounds = array<i64: 16, 8, 4>}, {transform_indices = @transform_1, window_bounds = array<i64: 16, 8, 4>}, {transform_indices = @transform_2, window_bounds = array<i64: 16, 4, 4>}, {transform_indices = @transform_3, window_bounds = array<i64: 16, 4, 4>}, {transform_indices = @transform_4, window_bounds = array<i64: 16, 8, 4>}, {transform_indices = @transform_5, window_bounds = array<i64: 16, 8, 4>}]} {
    %c0 = arith.constant 0 : index
    %c0_0 = arith.constant 0 : index
    %c0_1 = arith.constant 0 : index
    %0 = vector.load %arg1[%c0, %c0_0, %c0_1] : memref<16x8x4xbf16, #tpu.memory_space<vmem>>, vector<16x8x4xbf16>
    %c0_2 = arith.constant 0 : index
    %c0_3 = arith.constant 0 : index
    %c0_4 = arith.constant 0 : index
    %1 = vector.load %arg2[%c0_2, %c0_3, %c0_4] : memref<16x8x4xbf16, #tpu.memory_space<vmem>>, vector<16x8x4xbf16>
    %c0_5 = arith.constant 0 : index
    %c0_6 = arith.constant 0 : index
    %c0_7 = arith.constant 0 : index
    %2 = vector.load %arg3[%c0_5, %c0_6, %c0_7] : memref<16x4x4xbf16, #tpu.memory_space<vmem>>, vector<16x4x4xbf16>
    %c0_8 = arith.constant 0 : index
    %c0_9 = arith.constant 0 : index
    %c0_10 = arith.constant 0 : index
    %3 = vector.load %arg4[%c0_8, %c0_9, %c0_10] : memref<16x4x4xbf16, #tpu.memory_space<vmem>>, vector<16x4x4xbf16>
    %4 = arith.addf %0, %1 : vector<16x8x4xbf16>
    "tpu.trace_start"() <{level = 10 : i32, message = "mbi,mio->mbo"}> : () -> ()
    %cst = arith.constant dense<0.000000e+00> : vector<16x8x4xf32>
    %5 = tpu.matmul %4, %2, %cst {dimension_numbers = #tpu.dot_dimension_numbers<[2], [1], [1], [2], [0, 0, 0, 1, 1, 2], [0], [0]>} : vector<16x8x4xbf16>, vector<16x4x4xbf16>, vector<16x8x4xf32> -> vector<16x8x4xf32>
    "tpu.trace_stop"() : () -> ()
    %6 = arith.addf %2, %3 : vector<16x4x4xbf16>
    "tpu.trace_start"() <{level = 10 : i32, message = "mbi,mio->mbo"}> : () -> ()
    %cst_11 = arith.constant dense<0.000000e+00> : vector<16x8x4xf32>
    %7 = tpu.matmul %1, %6, %cst_11 {dimension_numbers = #tpu.dot_dimension_numbers<[2], [1], [1], [2], [0, 0, 0, 1, 1, 2], [0], [0]>} : vector<16x8x4xbf16>, vector<16x4x4xbf16>, vector<16x8x4xf32> -> vector<16x8x4xf32>
    "tpu.trace_stop"() : () -> ()
    %8 = arith.subf %5, %7 : vector<16x8x4xf32>
    %c0_12 = arith.constant 0 : index
    %c0_13 = arith.constant 0 : index
    %c0_14 = arith.constant 0 : index
    %9 = vector.load %arg5[%c0_12, %c0_13, %c0_14] : memref<16x8x4xf32, #tpu.memory_space<vmem>>, vector<16x8x4xf32>
    tpu.vector_store %arg5[%c0_12, %c0_13, %c0_14], %8 {strides = array<i32>} : memref<16x8x4xf32, #tpu.memory_space<vmem>>, vector<16x8x4xf32>,
    %10 = arith.subf %3, %2 : vector<16x4x4xbf16>
    "tpu.trace_start"() <{level = 10 : i32, message = "mbi,mio->mbo"}> : () -> ()
    %cst_15 = arith.constant dense<0.000000e+00> : vector<16x8x4xf32>
    %11 = tpu.matmul %0, %10, %cst_15 {dimension_numbers = #tpu.dot_dimension_numbers<[2], [1], [1], [2], [0, 0, 0, 1, 1, 2], [0], [0]>} : vector<16x8x4xbf16>, vector<16x4x4xbf16>, vector<16x8x4xf32> -> vector<16x8x4xf32>
    "tpu.trace_stop"() : () -> ()
    %12 = arith.addf %5, %11 : vector<16x8x4xf32>
    %c0_16 = arith.constant 0 : index
    %c0_17 = arith.constant 0 : index
    %c0_18 = arith.constant 0 : index
    %13 = vector.load %arg6[%c0_16, %c0_17, %c0_18] : memref<16x8x4xf32, #tpu.memory_space<vmem>>, vector<16x8x4xf32>
    tpu.vector_store %arg6[%c0_16, %c0_17, %c0_18], %12 {strides = array<i32>} : memref<16x8x4xf32, #tpu.memory_space<vmem>>, vector<16x8x4xf32>,
    return
  }
  func.func @transform_0(%arg0: i32) -> (i32, i32, i32) {
    %c0_i32 = arith.constant 0 : i32
    %c0_i32_0 = arith.constant 0 : i32
    %c0_i32_1 = arith.constant 0 : i32
    return %arg0, %c0_i32, %c0_i32_0 : i32, i32, i32
  }
  func.func @transform_1(%arg0: i32) -> (i32, i32, i32) {
    %c0_i32 = arith.constant 0 : i32
    %c0_i32_0 = arith.constant 0 : i32
    %c0_i32_1 = arith.constant 0 : i32
    return %arg0, %c0_i32, %c0_i32_0 : i32, i32, i32
  }
  func.func @transform_2(%arg0: i32) -> (i32, i32, i32) {
    %c0_i32 = arith.constant 0 : i32
    %c0_i32_0 = arith.constant 0 : i32
    %c0_i32_1 = arith.constant 0 : i32
    return %arg0, %c0_i32, %c0_i32_0 : i32, i32, i32
  }
  func.func @transform_3(%arg0: i32) -> (i32, i32, i32) {
    %c0_i32 = arith.constant 0 : i32
    %c0_i32_0 = arith.constant 0 : i32
    %c0_i32_1 = arith.constant 0 : i32
    return %arg0, %c0_i32, %c0_i32_0 : i32, i32, i32
  }
  func.func @transform_4(%arg0: i32) -> (i32, i32, i32) {
    %c0_i32 = arith.constant 0 : i32
    %c0_i32_0 = arith.constant 0 : i32
    %c0_i32_1 = arith.constant 0 : i32
    return %arg0, %c0_i32, %c0_i32_0 : i32, i32, i32
  }
  func.func @transform_5(%arg0: i32) -> (i32, i32, i32) {
    %c0_i32 = arith.constant 0 : i32
    %c0_i32_0 = arith.constant 0 : i32
    %c0_i32_1 = arith.constant 0 : i32
    return %arg0, %c0_i32, %c0_i32_0 : i32, i32, i32
  }
}

</mosaic_0001>

<bundles_post_ra>
// kernel: tpu_custom_call.1
= control target key start
LH: loop header
LB: loop body
LE: loop exit
PB: predicated region body
PF: predicated region fallthrough
CT: control target
= control target key end

     0   :  { %s3322_s18 = smov 0   ;;  %s4124_s0 = inlined_call_operand.vmem [shape: bf16[32,8,4], index: 0, kind: input, shape index: {}]   ;;  %s4125_s1 = inlined_call_operand.vmem [shape: bf16[32,8,4], index: 1, kind: input, shape index: {}]   ;;  %s4126_s2 = inlined_call_operand.vmem [shape: bf16[32,4,4], index: 2, kind: input, shape index: {}]   ;;  %s4127_s3 = inlined_call_operand.vmem [shape: bf16[32,4,4], index: 3, kind: input, shape index: {}]   ;;  %s4128_s4 = inlined_call_operand.vmem [shape: f32[32,8,4], index: 4, kind: output, shape index: {0}]   ;;  %s4129_s5 = inlined_call_operand.vmem [shape: f32[32,8,4], index: 5, kind: output, shape index: {1}]  }
   0x1 LB: > { %s2821_s19 = sadd.s32 4294967295, %s3288_s18   ;;  %p2825_p0 = scmp.ge.s32.totalorder %s3288_s18, 1  ;;  %s3288_s18 = sphi %s3322_s18, %s16_s18  }
   0x2   : > { %p224_p1 = scmp.lt.s32.totalorder %s3288_s18, 3 }
   0x4   : > { %p225_p2 = pnand %p2825_p0, %p224_p1 }
   0x6   : > { %228 = sbr.rel (%p225_p2) target bundleno = 424 (0x1a8), region = 36 }
   0xd   : > { %s2826_s20 = sshll.u32 %s2821_s19, 4  ;;  %v4132_v0 = vmov 0.0   ;;  %vm3291_vm0 = vmmov 0   ;;  %vm393_vm1 = vcmask 1041408   ;;  %vm389_vm2 = vcmask 31744  }
   0xe   : > { %2984 = vmatprep.subr.bf16.mxu0 %v4132_v0  ;;  %2990 = vmatprep.subr.bf16.mxu1 %v4132_v0  ;;  %p273_p3 = scmp.lt.s32.totalorder %s2826_s20, 31 }
   0xf   : > { %2986 = vmatprep.mubr.msk.bf16.mxu0 %vm3291_vm0, %v4132_v0  ;;  %2992 = vmatprep.mubr.msk.bf16.mxu1 %vm3291_vm0, %v4132_v0 }
  0x10   : > { %s4187_s20 = smov (!%p273_p3, %s2826_s20), 31 }
  0x11   : > { %s2831_s21 = sshll.u32 %s4187_s20, 1  ;;  %s2827_s22 = sshll.u32 %s4187_s20, 2 }
  0x12   : > { %s3343_s25 = scalar_lea.vmem %s4126_s2, %s2831_s21  ;;  %s3348_s28 = scalar_lea.vmem %s4127_s3, %s2831_s21 }
  0x13   : > { %v3351_v1 = vld [vmem:[%s3343_s25] sm:$0x3]  ;;  %v3357_v3 = vld [vmem:[%s3343_s25 + $0x2] sm:$0x3]  ;;  %s3362_s6 = scalar_lea.vmem %s4124_s0, %s2827_s22  ;;  %s3367_s9 = scalar_lea.vmem %s4125_s1, %s2827_s22  ;;  %v3399_v15 = vld [vmem:[%s3343_s25 + $0x4] sm:$0x3] }
  0x14   : > { %v3354_v2 = vld [vmem:[%s3348_s28] sm:$0x3]  ;;  %v395_v4 = vsel %vm393_vm1, %v3351_v1, 0  ;;  %v3374_v6 = vld [vmem:[%s3348_s28 + $0x2] sm:$0x3]  ;;  %v441_v7 = vsel %vm393_vm1, %v3357_v3, 0 }
  0x15   : > { %v1911_v5 = vsub.bf16 %v3354_v2, %v3351_v1  ;;  %v3379_v8 = vld [vmem:[%s3362_s6] sm:$0xf]  ;;  %2985 = vmatpush3.bf16.msra.mxu0 %v395_v4  ;;  %2991 = vmatpush3.bf16.msra.mxu1 %v441_v7  ;;  %v1912_v9 = vsub.bf16 %v3374_v6, %v3357_v3  ;;  %v3387_v11 = vld [vmem:[%s3362_s6 + $0x4] sm:$0xf]  ;;  %v487_v17 = vsel %vm393_vm1, %v3399_v15, 0  ;;  %s2835_s10 = sshll.u32 %s4187_s20, 3 }
  0x16   : > { %v3384_v10 = vld [vmem:[%s3367_s9] sm:$0xf]  ;;  %v3390_v12 = vld [vmem:[%s3367_s9 + $0x4] sm:$0xf]  ;;  %2996 = vmatprep.subr.bf16.mxu0 %v4132_v0  ;;  %3002 = vmatprep.subr.bf16.mxu1 %v4132_v0  ;;  %v3411_v19 = vld [vmem:[%s3362_s6 + $0x8] sm:$0xf]  ;;  %s4016_s13 = scalar_lea.vmem %s4128_s4, %s2835_s10  ;;  %s4071_s16 = scalar_lea.vmem %s4129_s5, %s2835_s10 }
  0x17   : > { %v373_v13 = vadd.bf16 %v3384_v10, %v3379_v8  ;;  %v374_v14 = vadd.bf16 %v3390_v12, %v3387_v11  ;;  %v3402_v16 = vld [vmem:[%s3343_s25 + $0x6] sm:$0x3]  ;;  %v3414_v20 = vld [vmem:[%s3367_s9 + $0x8] sm:$0xf]  ;;  %v3417_v21 = vld [vmem:[%s3362_s6 + $0xc] sm:$0xf] }
  0x18   : > { %v533_v18 = vsel %vm393_vm1, %v3402_v16, 0  ;;  %4143 = vst [vmem:[#allocation2_spill] sm:$0xff] %v3417_v21  ;;  %v3420_v22 = vld [vmem:[%s3367_s9 + $0xc] sm:$0xf]  ;;  %v3429_v23 = vld [vmem:[%s3343_s25 + $0x8] sm:$0x3]  ;;  %v375_v25 = vadd.bf16 %v3414_v20, %v3411_v19 }
  0x19   : > { %2987 = vmatmul.mubr.msk.bf16.vlgmr.msra.gmra.mrb[0].mxu0 %vm389_vm2, %v373_v13  ;;  %2993 = vmatmul.mubr.msk.bf16.vlgmr.msra.gmra.mrb[0].mxu1 %vm389_vm2, %v374_v14  ;;  %v3432_v24 = vld [vmem:[%s3343_s25 + $0xa] sm:$0x3]  ;;  %v376_v26 = vadd.bf16 %v3420_v22, %v3417_v21  ;;  %v579_v27 = vsel %vm393_vm1, %v3429_v23, 0  ;;  %v3445_v29 = vld [vmem:[%s3362_s6 + $0x10] sm:$0xf]  ;;  %v3451_v31 = vsel %vm393_vm1, %v1911_v5, 0  ;;  %v1128_v21 = vadd.bf16 %v3374_v6, %v3357_v3 }
  0x1a   : > { %2997 = vmatpush3.bf16.msra.mxu0 %v487_v17  ;;  %3003 = vmatpush3.bf16.msra.mxu1 %v533_v18  ;;  %v625_v28 = vsel %vm393_vm1, %v3432_v24, 0  ;;  %4144 = vst [vmem:[#allocation3_spill] sm:$0xff] %v3445_v29  ;;  %v3448_v30 = vld [vmem:[%s3367_s9 + $0x10] sm:$0xf]  ;;  %v3454_v32 = vld [vmem:[%s3362_s6 + $0x14] sm:$0xf] }
  0x1b   : > { %2998 = vmatprep.mubr.msk.bf16.mxu0 %vm3291_vm0, %v4132_v0  ;;  %3004 = vmatprep.mubr.msk.bf16.mxu1 %vm3291_vm0, %v4132_v0  ;;  %4145 = vst [vmem:[#allocation4_spill] sm:$0xff] %v3454_v32  ;;  %v3457_v33 = vld [vmem:[%s3367_s9 + $0x14] sm:$0xf]  ;;  %v3460_v34 = vsel %vm393_vm1, %v1912_v9, 0  ;;  %v3469_v35 = vld [vmem:[%s3343_s25 + $0xc] sm:$0x3]  ;;  %v377_v37 = vadd.bf16 %v3448_v30, %v3445_v29 }
  0x1c   : > { %3008 = vmatprep.subr.bf16.mxu0 %v4132_v0  ;;  %3014 = vmatprep.subr.bf16.mxu1 %v4132_v0  ;;  %v3472_v36 = vld [vmem:[%s3343_s25 + $0xe] sm:$0x3]  ;;  %v378_v38 = vadd.bf16 %v3457_v33, %v3454_v32  ;;  %v671_v39 = vsel %vm393_vm1, %v3469_v35, 0  ;;  %v3485_v41 = vld [vmem:[%s3362_s6 + $0x18] sm:$0xf]  ;;  %v1193_v6 = vsel %vm393_vm1, %v1128_v21, 0 }
  0x1d   : > { %v717_v40 = vsel %vm393_vm1, %v3472_v36, 0  ;;  %4146 = vst [vmem:[#allocation5_spill] sm:$0xff] %v3485_v41  ;;  %v3488_v42 = vld [vmem:[%s3367_s9 + $0x18] sm:$0xf]  ;;  %v3491_v43 = vld [vmem:[%s3362_s6 + $0x1c] sm:$0xf] }
  0x1e   : > { %4147 = vst [vmem:[#allocation6_spill] sm:$0xff] %v3491_v43  ;;  %v3494_v44 = vld [vmem:[%s3367_s9 + $0x1c] sm:$0xf]  ;;  %v3503_v45 = vld [vmem:[%s3343_s25 + $0x10] sm:$0x3]  ;;  %v379_v47 = vadd.bf16 %v3488_v42, %v3485_v41 }
  0x1f   : > { %v3506_v46 = vld [vmem:[%s3343_s25 + $0x12] sm:$0x3]  ;;  %v380_v48 = vadd.bf16 %v3494_v44, %v3491_v43  ;;  %v3513_v49 = vld [vmem:[%s3348_s28 + $0x4] sm:$0x3]  ;;  %v763_v50 = vsel %vm393_vm1, %v3503_v45, 0 }
  0x20   : > { %v809_v51 = vsel %vm393_vm1, %v3506_v46, 0  ;;  %v3520_v52 = vld [vmem:[%s3348_s28 + $0x6] sm:$0x3]  ;;  %v1913_v53 = vsub.bf16 %v3513_v49, %v3399_v15  ;;  %v3525_v54 = vld [vmem:[%s3362_s6 + $0x20] sm:$0xf] }
  0x21   : > { %2999 = vmatmul.mubr.msk.bf16.vlgmr.msra.gmra.mrb[4].mxu0 %vm389_vm2, %v375_v25  ;;  %3005 = vmatmul.mubr.msk.bf16.vlgmr.msra.gmra.mrb[4].mxu1 %vm389_vm2, %v376_v26  ;;  %4148 = vst [vmem:[#allocation7_spill] sm:$0xff] %v3525_v54  ;;  %v3528_v55 = vld [vmem:[%s3367_s9 + $0x20] sm:$0xf]  ;;  %v3531_v56 = vld [vmem:[%s3362_s6 + $0x24] sm:$0xf]  ;;  %v1914_v60 = vsub.bf16 %v3520_v52, %v3402_v16 }
  0x22   : > { %3009 = vmatpush3.bf16.msra.mxu0 %v579_v27  ;;  %3015 = vmatpush3.bf16.msra.mxu1 %v625_v28  ;;  %4149 = vst [vmem:[#allocation8_spill] sm:$0xff] %v3531_v56  ;;  %v3534_v57 = vld [vmem:[%s3348_s28 + $0x8] sm:$0x3]  ;;  %v3537_v58 = vld [vmem:[%s3348_s28 + $0xa] sm:$0x3]  ;;  %v3553_v63 = vsel %vm393_vm1, %v1913_v53, 0 }
  0x23   : > { %3010 = vmatprep.mubr.msk.bf16.mxu0 %vm3291_vm0, %v4132_v0  ;;  %3016 = vmatprep.mubr.msk.bf16.mxu1 %vm3291_vm0, %v4132_v0  ;;  %v3540_v59 = vld [vmem:[%s3348_s28 + $0xc] sm:$0x3]  ;;  %v3547_v61 = vld [vmem:[%s3348_s28 + $0xe] sm:$0x3]  ;;  %v3550_v62 = vld [vmem:[%s3348_s28 + $0x10] sm:$0x3]  ;;  %v1915_v4 = vsub.bf16 %v3534_v57, %v3429_v23  ;;  %v1916_v5 = vsub.bf16 %v3537_v58, %v3432_v24 }
  0x24   : > { %3020 = vmatprep.subr.bf16.mxu0 %v4132_v0  ;;  %3026 = vmatprep.subr.bf16.mxu1 %v4132_v0  ;;  %v3560_v7 = vld [vmem:[%s3367_s9 + $0x24] sm:$0xf]  ;;  %v3563_v9 = vld [vmem:[%s3348_s28 + $0x12] sm:$0x3]  ;;  %v3566_v13 = vsel %vm393_vm1, %v1914_v60, 0  ;;  %v1917_v14 = vsub.bf16 %v3540_v59, %v3469_v35  ;;  %v1918_v17 = vsub.bf16 %v3547_v61, %v3472_v36  ;;  %v1919_v18 = vsub.bf16 %v3550_v62, %v3503_v45 }
  0x25   : > { %v3579_v25 = vld [vmem:[%s3343_s25 + $0x14] sm:$0x3]  ;;  %v3582_v26 = vsel %vm393_vm1, %v1915_v4, 0  ;;  %v3585_v27 = vsel %vm393_vm1, %v1916_v5, 0  ;;  %v1920_v28 = vsub.bf16 %v3563_v9, %v3506_v46  ;;  %v3620_v4 = vld [vmem:[%s3362_s6 + $0x28] sm:$0xf] }
  0x26   : > { %4150 = vst [vmem:[#allocation9_spill] sm:$0xff] %v3582_v26  ;;  %4151 = vst [vmem:[#allocation10_spill] sm:$0xff] %v3585_v27  ;;  %v3615_v60 = vld [vmem:[%s3348_s28 + $0x14] sm:$0x3]  ;;  %v3623_v5 = vld [vmem:[%s3348_s28 + $0x16] sm:$0x3] }
  0x27   : > { %4156 = vst [vmem:[#allocation15_spill] sm:$0xff] %v3620_v4  ;;  %v3684_v43 = vld [vmem:[%s3367_s9 + $0x34] sm:$0xf]  ;;  %v3701_v41 = vld [vmem:[%s3343_s25 + $0x1e] sm:$0x3] }
  0x28   : > { %v1085_v32 = vsel %vm393_vm1, %v3701_v41, 0  ;;  %v3715_v29 = vld [vmem:[%s3348_s28 + $0x1c] sm:$0x3] }
  0x29   : > { %3011 = vmatmul.mubr.msk.bf16.vlgmr.msra.gmra.mrb[8].mxu0 %vm389_vm2, %v377_v37  ;;  %3017 = vmatmul.mubr.msk.bf16.vlgmr.msra.gmra.mrb[8].mxu1 %vm389_vm2, %v378_v38  ;;  %v3592_v37 = vld [vmem:[%s3343_s25 + $0x16] sm:$0x3]  ;;  %v3595_v38 = vsel %vm393_vm1, %v1917_v14, 0  ;;  %v1921_v14 = vsub.bf16 %v3615_v60, %v3579_v25  ;;  %v3731_v27 = vld [vmem:[%s3362_s6 + $0x3c] sm:$0xf] }
  0x2a   : > { %3021 = vmatpush3.bf16.msra.mxu0 %v671_v39  ;;  %3027 = vmatpush3.bf16.msra.mxu1 %v717_v40  ;;  %4152 = vst [vmem:[#allocation11_spill] sm:$0xff] %v3595_v38  ;;  %v3598_v39 = vsel %vm393_vm1, %v1918_v17, 0  ;;  %v3601_v40 = vsel %vm393_vm1, %v1919_v18, 0  ;;  %v901_v53 = vsel %vm393_vm1, %v3592_v37, 0  ;;  %v3628_v17 = vld [vmem:[%s3367_s9 + $0x28] sm:$0xf] }
  0x2b   : > { %3022 = vmatprep.mubr.msk.bf16.mxu0 %vm3291_vm0, %v4132_v0  ;;  %3028 = vmatprep.mubr.msk.bf16.mxu1 %vm3291_vm0, %v4132_v0  ;;  %4153 = vst [vmem:[#allocation12_spill] sm:$0xff] %v3598_v39  ;;  %4154 = vst [vmem:[#allocation13_spill] sm:$0xff] %v3601_v40  ;;  %v3631_v18 = vld [vmem:[%s3362_s6 + $0x2c] sm:$0xf]  ;;  %v3681_v40 = vld [vmem:[%s3362_s6 + $0x34] sm:$0xf] }
  0x2c   : > { %3032 = vmatprep.subr.bf16.mxu0 %v4132_v0  ;;  %3038 = vmatprep.subr.bf16.mxu1 %v4132_v0  ;;  %4157 = vst [vmem:[#allocation16_spill] sm:$0xff] %v3631_v18  ;;  %4161 = vst [vmem:[#allocation20_spill] sm:$0xff] %v3681_v40  ;;  %v3734_v26 = vld [vmem:[%s3367_s9 + $0x3c] sm:$0xf] }
  0x31   : > { %3023 = vmatmul.mubr.msk.bf16.vlgmr.msra.gmra.mrb[12].mxu0 %vm389_vm2, %v379_v47  ;;  %3029 = vmatmul.mubr.msk.bf16.vlgmr.msra.gmra.mrb[12].mxu1 %vm389_vm2, %v380_v48  ;;  %v381_v47 = vadd.bf16 %v3528_v55, %v3525_v54  ;;  %v382_v48 = vadd.bf16 %v3560_v7, %v3531_v56  ;;  %v383_v54 = vadd.bf16 %v3628_v17, %v3620_v4  ;;  %v3673_v4 = vld [vmem:[%s3348_s28 + $0x1a] sm:$0x3] }
  0x32   : > { %3033 = vmatpush3.bf16.msra.mxu0 %v763_v50  ;;  %3039 = vmatpush3.bf16.msra.mxu1 %v809_v51  ;;  %v3608_v50 = vsel %vm393_vm1, %v1920_v28, 0  ;;  %v855_v51 = vsel %vm393_vm1, %v3579_v25, 0  ;;  %v3634_v28 = vld [vmem:[%s3367_s9 + $0x2c] sm:$0xf] }
  0x33   : > { %3034 = vmatprep.mubr.msk.bf16.mxu0 %vm3291_vm0, %v4132_v0  ;;  %3040 = vmatprep.mubr.msk.bf16.mxu1 %vm3291_vm0, %v4132_v0  ;;  %4155 = vst [vmem:[#allocation14_spill] sm:$0xff] %v3608_v50  ;;  %v3665_v50 = vld [vmem:[%s3348_s28 + $0x18] sm:$0x3] }
  0x34   : > { %3044 = vmatprep.subr.bf16.mxu0 %v4132_v0  ;;  %3050 = vmatprep.subr.bf16.mxu1 %v4132_v0 }
  0x39   : > { %3035 = vmatmul.mubr.msk.bf16.vlgmr.msra.gmra.mrb[16].mxu0 %vm389_vm2, %v381_v47  ;;  %3041 = vmatmul.mubr.msk.bf16.vlgmr.msra.gmra.mrb[16].mxu1 %vm389_vm2, %v382_v48  ;;  %v1922_v47 = vsub.bf16 %v3623_v5, %v3592_v37  ;;  %v3643_v48 = vsel %vm393_vm1, %v1921_v14, 0  ;;  %v384_v14 = vadd.bf16 %v3634_v28, %v3631_v18 }
  0x3a   : > { %3045 = vmatpush3.bf16.msra.mxu0 %v855_v51  ;;  %3051 = vmatpush3.bf16.msra.mxu1 %v901_v53  ;;  %4158 = vst [vmem:[#allocation17_spill] sm:$0xff] %v3643_v48  ;;  %v3648_v51 = vld [vmem:[%s3343_s25 + $0x18] sm:$0x3]  ;;  %v3651_v53 = vld [vmem:[%s3343_s25 + $0x1a] sm:$0x3] }
  0x3b   : > { %3046 = vmatprep.mubr.msk.bf16.mxu0 %vm3291_vm0, %v4132_v0  ;;  %3052 = vmatprep.mubr.msk.bf16.mxu1 %vm3291_vm0, %v4132_v0  ;;  %v3654_v56 = vsel %vm393_vm1, %v1922_v47, 0  ;;  %v947_v48 = vsel %vm393_vm1, %v3648_v51, 0  ;;  %v3670_v47 = vld [vmem:[%s3362_s6 + $0x30] sm:$0xf]  ;;  %v1923_v18 = vsub.bf16 %v3665_v50, %v3648_v51 }
  0x3c   : > { %3056 = vmatprep.subr.bf16.mxu0 %v4132_v0  ;;  %3062 = vmatprep.subr.bf16.mxu1 %v4132_v0  ;;  %4159 = vst [vmem:[#allocation18_spill] sm:$0xff] %v3654_v56  ;;  %v993_v0 = vsel %vm393_vm1, %v3651_v53, 0  ;;  %4160 = vst [vmem:[#allocation19_spill] sm:$0xff] %v3670_v47  ;;  %v3678_v56 = vld [vmem:[%s3367_s9 + $0x30] sm:$0xf] }
  0x3d   : > { %v385_v38 = vadd.bf16 %v3678_v56, %v3670_v47 }
  0x41   : > { %3047 = vmatmul.mubr.msk.bf16.vlgmr.msra.gmra.mrb[20].mxu0 %vm389_vm2, %v383_v54  ;;  %3053 = vmatmul.mubr.msk.bf16.vlgmr.msra.gmra.mrb[20].mxu1 %vm389_vm2, %v384_v14  ;;  %v1924_v54 = vsub.bf16 %v3673_v4, %v3651_v53  ;;  %v4162_v14 = vmov 0.0  }
  0x42   : > { %3057 = vmatpush3.bf16.msra.mxu0 %v947_v48  ;;  %3063 = vmatpush3.bf16.msra.mxu1 %v993_v0  ;;  %v3693_v0 = vsel %vm393_vm1, %v1923_v18, 0  ;;  %v3698_v48 = vld [vmem:[%s3343_s25 + $0x1c] sm:$0x3]  ;;  %v386_v18 = vadd.bf16 %v3684_v43, %v3681_v40  ;;  %v3728_v40 = vld [vmem:[%s3367_s9 + $0x38] sm:$0xf] }
  0x43   : > { %3058 = vmatprep.mubr.msk.bf16.mxu0 %vm3291_vm0, %v4162_v14  ;;  %3064 = vmatprep.mubr.msk.bf16.mxu1 %vm3291_vm0, %v4162_v14  ;;  %4163 = vst [vmem:[#allocation21_spill] sm:$0xff] %v3693_v0  ;;  %v3704_v39 = vsel %vm393_vm1, %v1924_v54, 0  ;;  %v1039_v0 = vsel %vm393_vm1, %v3698_v48, 0  ;;  %v3720_v54 = vld [vmem:[%s3362_s6 + $0x38] sm:$0xf]  ;;  %v1925_v47 = vsub.bf16 %v3715_v29, %v3698_v48 }
  0x44   : > { %3068 = vmatprep.subr.bf16.mxu0 %v4162_v14  ;;  %3074 = vmatprep.subr.bf16.mxu1 %v4162_v14  ;;  %4164 = vst [vmem:[#allocation22_spill] sm:$0xff] %v3704_v39  ;;  %v3723_v39 = vld [vmem:[%s3348_s28 + $0x1e] sm:$0x3] }
  0x49   : > { %3059 = vmatmul.mubr.msk.bf16.vlgmr.msra.gmra.mrb[24].mxu0 %vm389_vm2, %v385_v38  ;;  %3065 = vmatmul.mubr.msk.bf16.vlgmr.msra.gmra.mrb[24].mxu1 %vm389_vm2, %v386_v18  ;;  %v1926_v38 = vsub.bf16 %v3723_v39, %v3701_v41  ;;  %v1127_v18 = vadd.bf16 %v3354_v2, %v3351_v1  ;;  %v387_v1 = vadd.bf16 %v3728_v40, %v3720_v54 }
  0x4a   : > { %3069 = vmatpush3.bf16.msra.mxu0 %v1039_v0  ;;  %3075 = vmatpush3.bf16.msra.mxu1 %v1085_v32  ;;  %v3747_v32 = vsel %vm393_vm1, %v1925_v47, 0  ;;  %v388_v2 = vadd.bf16 %v3734_v26, %v3731_v27  ;;  %v1129_v47 = vadd.bf16 %v3513_v49, %v3399_v15  ;;  %v1131_v15 = vadd.bf16 %v3534_v57, %v3429_v23 }
  0x4b   : > { %3070 = vmatprep.mubr.msk.bf16.mxu0 %vm3291_vm0, %v4162_v14  ;;  %3076 = vmatprep.mubr.msk.bf16.mxu1 %vm3291_vm0, %v4162_v14  ;;  %v3752_v0 = vsel %vm393_vm1, %v1926_v38, 0  ;;  %v1147_v3 = vsel %vm393_vm1, %v1127_v18, 0  ;;  %v1130_v38 = vadd.bf16 %v3520_v52, %v3402_v16  ;;  %v1132_v16 = vadd.bf16 %v3537_v58, %v3432_v24 }
  0x4c   : > { %3080 = vmatprep.subr.bf16.mxu0 %v4162_v14  ;;  %3086 = vmatprep.subr.bf16.mxu1 %v4162_v14  ;;  %v1239_v21 = vsel %vm393_vm1, %v1129_v47, 0  ;;  %v1133_v23 = vadd.bf16 %v3540_v59, %v3469_v35  ;;  %v1134_v24 = vadd.bf16 %v3547_v61, %v3472_v36  ;;  %v1135_v35 = vadd.bf16 %v3550_v62, %v3503_v45 }
  0x4d   : > { %v1285_v18 = vsel %vm393_vm1, %v1130_v38, 0  ;;  %v1136_v36 = vadd.bf16 %v3563_v9, %v3506_v46  ;;  %v1137_v45 = vadd.bf16 %v3615_v60, %v3579_v25  ;;  %v1138_v46 = vadd.bf16 %v3623_v5, %v3592_v37  ;;  %v4176_v9 = vld [vmem:[#allocation7_spill] sm:$0xff]  ;;  %v4178_v25 = vld [vmem:[#allocation17_spill] sm:$0xff] }
  0x4e   : > { %v1139_v49 = vadd.bf16 %v3665_v50, %v3648_v51  ;;  %v1140_v52 = vadd.bf16 %v3673_v4, %v3651_v53  ;;  %v1141_v58 = vadd.bf16 %v3715_v29, %v3698_v48  ;;  %v1142_v59 = vadd.bf16 %v3723_v39, %v3701_v41  ;;  %v4167_v29 = vld [vmem:[#allocation10_spill] sm:$0xff]  ;;  %v4171_v41 = vld [vmem:[#allocation12_spill] sm:$0xff]  ;;  %v4180_v37 = vld [vmem:[#allocation15_spill] sm:$0xff] }
  0x4f   : > { %v4181_v39 = vld [vmem:[#allocation16_spill] sm:$0xff]  ;;  %v4183_v50 = vld [vmem:[#allocation22_spill] sm:$0xff]  ;;  %v4184_v60 = vld [vmem:[#allocation19_spill] sm:$0xff] }
  0x50   : > { %v1745_v57 = vsel %vm393_vm1, %v1140_v52, 0  ;;  %v1791_v61 = vsel %vm393_vm1, %v1141_v58, 0  ;;  %v1837_v62 = vsel %vm393_vm1, %v1142_v59, 0  ;;  %v4185_v4 = vld [vmem:[#allocation20_spill] sm:$0xff] }
  0x51   : > { %3071 = vmatmul.mubr.msk.bf16.vlgmr.msra.gmra.mrb[28].mxu0 %vm389_vm2, %v387_v1  ;;  %3077 = vmatmul.mubr.msk.bf16.vlgmr.msra.gmra.mrb[28].mxu1 %vm389_vm2, %v388_v2 }
  0x52   : > { %3081 = vmatpush3.bf16.msra.mxu0 %v1147_v3  ;;  %3087 = vmatpush3.bf16.msra.mxu1 %v1193_v6 }
  0x53   : > { %3082 = vmatprep.mubr.msk.bf16.mxu0 %vm3291_vm0, %v4162_v14  ;;  %3088 = vmatprep.mubr.msk.bf16.mxu1 %vm3291_vm0, %v4162_v14 }
  0x54   : > { %3092 = vmatprep.subr.bf16.mxu0 %v4162_v14  ;;  %3098 = vmatprep.subr.bf16.mxu1 %v4162_v14 }
  0x59   : > { %3083 = vmatmul.mubr.msk.bf16.vlgmr.msra.gmra.mrb[32].mxu0 %vm389_vm2, %v3384_v10  ;;  %3089 = vmatmul.mubr.msk.bf16.vlgmr.msra.gmra.mrb[32].mxu1 %vm389_vm2, %v3390_v12  ;;  %v1331_v10 = vsel %vm393_vm1, %v1131_v15, 0  ;;  %v1377_v12 = vsel %vm393_vm1, %v1132_v16, 0 }
  0x5a   : > { %3093 = vmatpush3.bf16.msra.mxu0 %v1239_v21  ;;  %3099 = vmatpush3.bf16.msra.mxu1 %v1285_v18 }
  0x5b   : > { %3094 = vmatprep.mubr.msk.bf16.mxu0 %vm3291_vm0, %v4162_v14  ;;  %3100 = vmatprep.mubr.msk.bf16.mxu1 %vm3291_vm0, %v4162_v14 }
  0x5c   : > { %3104 = vmatprep.subr.bf16.mxu0 %v4162_v14  ;;  %3110 = vmatprep.subr.bf16.mxu1 %v4162_v14 }
  0x61   : > { %3095 = vmatmul.mubr.msk.bf16.vlgmr.msra.gmra.mrb[36].mxu0 %vm389_vm2, %v3414_v20  ;;  %3101 = vmatmul.mubr.msk.bf16.vlgmr.msra.gmra.mrb[36].mxu1 %vm389_vm2, %v3420_v22  ;;  %v1423_v20 = vsel %vm393_vm1, %v1133_v23, 0  ;;  %v1469_v22 = vsel %vm393_vm1, %v1134_v24, 0 }
  0x62   : > { %3105 = vmatpush3.bf16.msra.mxu0 %v1331_v10  ;;  %3111 = vmatpush3.bf16.msra.mxu1 %v1377_v12 }
  0x63   : > { %3106 = vmatprep.mubr.msk.bf16.mxu0 %vm3291_vm0, %v4162_v14  ;;  %3112 = vmatprep.mubr.msk.bf16.mxu1 %vm3291_vm0, %v4162_v14 }
  0x64   : > { %3116 = vmatprep.subr.bf16.mxu0 %v4162_v14  ;;  %3122 = vmatprep.subr.bf16.mxu1 %v4162_v14 }
  0x69   : > { %3107 = vmatmul.mubr.msk.bf16.vlgmr.msra.gmra.mrb[40].mxu0 %vm389_vm2, %v3448_v30  ;;  %3113 = vmatmul.mubr.msk.bf16.vlgmr.msra.gmra.mrb[40].mxu1 %vm389_vm2, %v3457_v33  ;;  %v1515_v30 = vsel %vm393_vm1, %v1135_v35, 0  ;;  %v1561_v33 = vsel %vm393_vm1, %v1136_v36, 0 }
  0x6a   : > { %3117 = vmatpush3.bf16.msra.mxu0 %v1423_v20  ;;  %3123 = vmatpush3.bf16.msra.mxu1 %v1469_v22 }
  0x6b   : > { %3118 = vmatprep.mubr.msk.bf16.mxu0 %vm3291_vm0, %v4162_v14  ;;  %3124 = vmatprep.mubr.msk.bf16.mxu1 %vm3291_vm0, %v4162_v14 }
  0x6c   : > { %3128 = vmatprep.subr.bf16.mxu0 %v4162_v14  ;;  %3134 = vmatprep.subr.bf16.mxu1 %v4162_v14 }
  0x71   : > { %3119 = vmatmul.mubr.msk.bf16.vlgmr.msra.gmra.mrb[44].mxu0 %vm389_vm2, %v3488_v42  ;;  %3125 = vmatmul.mubr.msk.bf16.vlgmr.msra.gmra.mrb[44].mxu1 %vm389_vm2, %v3494_v44  ;;  %v1607_v42 = vsel %vm393_vm1, %v1137_v45, 0  ;;  %v1653_v44 = vsel %vm393_vm1, %v1138_v46, 0 }
  0x72   : > { %3129 = vmatpush3.bf16.msra.mxu0 %v1515_v30  ;;  %3135 = vmatpush3.bf16.msra.mxu1 %v1561_v33 }
  0x73   : > { %3130 = vmatprep.mubr.msk.bf16.mxu0 %vm3291_vm0, %v4162_v14  ;;  %3136 = vmatprep.mubr.msk.bf16.mxu1 %vm3291_vm0, %v4162_v14 }
  0x74   : > { %3140 = vmatprep.subr.bf16.mxu0 %v4162_v14  ;;  %3146 = vmatprep.subr.bf16.mxu1 %v4162_v14 }
  0x79   : > { %3131 = vmatmul.mubr.msk.bf16.vlgmr.msra.gmra.mrb[48].mxu0 %vm389_vm2, %v3528_v55  ;;  %3137 = vmatmul.mubr.msk.bf16.vlgmr.msra.gmra.mrb[48].mxu1 %vm389_vm2, %v3560_v7  ;;  %v1699_v55 = vsel %vm393_vm1, %v1139_v49, 0  ;;  %v4175_v7 = vld [vmem:[#allocation14_spill] sm:$0xff] }
  0x7a   : > { %3141 = vmatpush3.bf16.msra.mxu0 %v1607_v42  ;;  %3147 = vmatpush3.bf16.msra.mxu1 %v1653_v44 }
  0x7b   : > { %3142 = vmatprep.mubr.msk.bf16.mxu0 %vm3291_vm0, %v4162_v14  ;;  %3148 = vmatprep.mubr.msk.bf16.mxu1 %vm3291_vm0, %v4162_v14 }
  0x7c   : > { %3152 = vmatprep.subr.bf16.mxu0 %v4162_v14  ;;  %3158 = vmatprep.subr.bf16.mxu1 %v4162_v14 }
  0x81   : > { %3143 = vmatmul.mubr.msk.bf16.vlgmr.msra.gmra.mrb[52].mxu0 %vm389_vm2, %v3628_v17  ;;  %3149 = vmatmul.mubr.msk.bf16.vlgmr.msra.gmra.mrb[52].mxu1 %vm389_vm2, %v3634_v28 }
  0x82   : > { %3153 = vmatpush3.bf16.msra.mxu0 %v1699_v55  ;;  %3159 = vmatpush3.bf16.msra.mxu1 %v1745_v57 }
  0x83   : > { %3154 = vmatprep.mubr.msk.bf16.mxu0 %vm3291_vm0, %v4162_v14  ;;  %3160 = vmatprep.mubr.msk.bf16.mxu1 %vm3291_vm0, %v4162_v14 }
  0x84   : > { %3164 = vmatprep.subr.bf16.mxu0 %v4162_v14  ;;  %3170 = vmatprep.subr.bf16.mxu1 %v4162_v14 }
  0x89   : > { %3155 = vmatmul.mubr.msk.bf16.vlgmr.msra.gmra.mrb[56].mxu0 %vm389_vm2, %v3678_v56  ;;  %3161 = vmatmul.mubr.msk.bf16.vlgmr.msra.gmra.mrb[56].mxu1 %vm389_vm2, %v3684_v43  ;;  %v4172_v43 = vld [vmem:[#allocation5_spill] sm:$0xff]  ;;  %v4173_v56 = vld [vmem:[#allocation6_spill] sm:$0xff] }
  0x8a   : > { %3165 = vmatpush3.bf16.msra.mxu0 %v1791_v61  ;;  %3171 = vmatpush3.bf16.msra.mxu1 %v1837_v62 }
  0x8b   : > { %3166 = vmatprep.mubr.msk.bf16.mxu0 %vm3291_vm0, %v4162_v14  ;;  %3172 = vmatprep.mubr.msk.bf16.mxu1 %vm3291_vm0, %v4162_v14 }
  0x8c   : > { %3176 = vmatprep.subr.bf16.mxu0 %v4162_v14  ;;  %3182 = vmatprep.subr.bf16.mxu1 %v4162_v14 }
  0x91   : > { %3167 = vmatmul.mubr.msk.bf16.vlgmr.msra.gmra.mrb[60].mxu0 %vm389_vm2, %v3728_v40  ;;  %3173 = vmatmul.mubr.msk.bf16.vlgmr.msra.gmra.mrb[60].mxu1 %vm389_vm2, %v3734_v26  ;;  %v4179_v26 = vld [vmem:[#allocation18_spill] sm:$0xff]  ;;  %v4182_v40 = vld [vmem:[#allocation21_spill] sm:$0xff] }
  0x92   : > { %3177 = vmatpush3.bf16.msra.mxu0 %v3451_v31  ;;  %3183 = vmatpush3.bf16.msra.mxu1 %v3460_v34  ;;  %v4168_v31 = vld [vmem:[#allocation3_spill] sm:$0xff] }
  0x93   : > { %3178 = vmatprep.mubr.msk.bf16.mxu0 %vm3291_vm0, %v4162_v14  ;;  %3184 = vmatprep.mubr.msk.bf16.mxu1 %vm3291_vm0, %v4162_v14  ;;  %v4170_v34 = vld [vmem:[#allocation11_spill] sm:$0xff] }
  0x94   : > { %3188 = vmatprep.subr.bf16.mxu0 %v4162_v14  ;;  %3194 = vmatprep.subr.bf16.mxu1 %v4162_v14 }
  0x99   : > { %3179 = vmatmul.mubr.msk.bf16.vlgmr.msra.gmra.mrb[64].mxu0 %vm389_vm2, %v3379_v8  ;;  %3185 = vmatmul.mubr.msk.bf16.vlgmr.msra.gmra.mrb[64].mxu1 %vm389_vm2, %v3387_v11  ;;  %v4165_v8 = vld [vmem:[#allocation2_spill] sm:$0xff]  ;;  %v4166_v11 = vld [vmem:[#allocation9_spill] sm:$0xff] }
  0x9a   : > { %3189 = vmatpush3.bf16.msra.mxu0 %v3553_v63  ;;  %3195 = vmatpush3.bf16.msra.mxu1 %v3566_v13  ;;  %v4174_v63 = vld [vmem:[#allocation13_spill] sm:$0xff]  ;;  %v4177_v13 = vld [vmem:[#allocation8_spill] sm:$0xff] }
  0x9b   : > { %3190 = vmatprep.mubr.msk.bf16.mxu0 %vm3291_vm0, %v4162_v14  ;;  %3196 = vmatprep.mubr.msk.bf16.mxu1 %vm3291_vm0, %v4162_v14 }
  0x9c   : > { %3200 = vmatprep.subr.bf16.mxu0 %v4162_v14  ;;  %3206 = vmatprep.subr.bf16.mxu1 %v4162_v14 }
  0xa1   : > { %3191 = vmatmul.mubr.msk.bf16.vlgmr.msra.gmra.mrb[68].mxu0 %vm389_vm2, %v3411_v19  ;;  %3197 = vmatmul.mubr.msk.bf16.vlgmr.msra.gmra.mrb[68].mxu1 %vm389_vm2, %v4165_v8  ;;  %v4169_v19 = vld [vmem:[#allocation4_spill] sm:$0xff] }
  0xa2   : > { %3201 = vmatpush3.bf16.msra.mxu0 %v4166_v11  ;;  %3207 = vmatpush3.bf16.msra.mxu1 %v4167_v29 }
  0xa3   : > { %3202 = vmatprep.mubr.msk.bf16.mxu0 %vm3291_vm0, %v4162_v14  ;;  %3208 = vmatprep.mubr.msk.bf16.mxu1 %vm3291_vm0, %v4162_v14 }
  0xa4   : > { %3212 = vmatprep.subr.bf16.mxu0 %v4162_v14  ;;  %3218 = vmatprep.subr.bf16.mxu1 %v4162_v14 }
  0xa9   : > { %3203 = vmatmul.mubr.msk.bf16.vlgmr.msra.gmra.mrb[72].mxu0 %vm389_vm2, %v4168_v31  ;;  %3209 = vmatmul.mubr.msk.bf16.vlgmr.msra.gmra.mrb[72].mxu1 %vm389_vm2, %v4169_v19 }
  0xaa   : > { %3213 = vmatpush3.bf16.msra.mxu0 %v4170_v34  ;;  %3219 = vmatpush3.bf16.msra.mxu1 %v4171_v41 }
  0xab   : > { %3214 = vmatprep.mubr.msk.bf16.mxu0 %vm3291_vm0, %v4162_v14  ;;  %3220 = vmatprep.mubr.msk.bf16.mxu1 %vm3291_vm0, %v4162_v14 }
  0xac   : > { %3224 = vmatprep.subr.bf16.mxu0 %v4162_v14  ;;  %3230 = vmatprep.subr.bf16.mxu1 %v4162_v14 }
  0xb1   : > { %3215 = vmatmul.mubr.msk.bf16.vlgmr.msra.gmra.mrb[76].mxu0 %vm389_vm2, %v4172_v43  ;;  %3221 = vmatmul.mubr.msk.bf16.vlgmr.msra.gmra.mrb[76].mxu1 %vm389_vm2, %v4173_v56 }
  0xb2   : > { %3225 = vmatpush3.bf16.msra.mxu0 %v4174_v63  ;;  %3231 = vmatpush3.bf16.msra.mxu1 %v4175_v7 }
  0xb3   : > { %3226 = vmatprep.mubr.msk.bf16.mxu0 %vm3291_vm0, %v4162_v14  ;;  %3232 = vmatprep.mubr.msk.bf16.mxu1 %vm3291_vm0, %v4162_v14 }
  0xb4   : > { %3236 = vmatprep.subr.bf16.mxu0 %v4162_v14  ;;  %3242 = vmatprep.subr.bf16.mxu1 %v4162_v14 }
  0xb9   : > { %3227 = vmatmul.mubr.msk.bf16.vlgmr.msra.gmra.mrb[80].mxu0 %vm389_vm2, %v4176_v9  ;;  %3233 = vmatmul.mubr.msk.bf16.vlgmr.msra.gmra.mrb[80].mxu1 %vm389_vm2, %v4177_v13 }
  0xba   : > { %3237 = vmatpush3.bf16.msra.mxu0 %v4178_v25  ;;  %3243 = vmatpush3.bf16.msra.mxu1 %v4179_v26 }
  0xbb   : > { %3238 = vmatprep.mubr.msk.bf16.mxu0 %vm3291_vm0, %v4162_v14  ;;  %3244 = vmatprep.mubr.msk.bf16.mxu1 %vm3291_vm0, %v4162_v14 }
  0xbc   : > { %3248 = vmatprep.subr.bf16.mxu0 %v4162_v14  ;;  %3254 = vmatprep.subr.bf16.mxu1 %v4162_v14 }
  0xc1   : > { %3239 = vmatmul.mubr.msk.bf16.vlgmr.msra.gmra.mrb[84].mxu0 %vm389_vm2, %v4180_v37  ;;  %3245 = vmatmul.mubr.msk.bf16.vlgmr.msra.gmra.mrb[84].mxu1 %vm389_vm2, %v4181_v39 }
  0xc2   : > { %3249 = vmatpush3.bf16.msra.mxu0 %v4182_v40  ;;  %3255 = vmatpush3.bf16.msra.mxu1 %v4183_v50 }
  0xc3   : > { %3250 = vmatprep.mubr.msk.bf16.mxu0 %vm3291_vm0, %v4162_v14  ;;  %3256 = vmatprep.mubr.msk.bf16.mxu1 %vm3291_vm0, %v4162_v14 }
  0xc4   : > { %3260 = vmatprep.subr.bf16.mxu0 %v4162_v14  ;;  %3266 = vmatprep.subr.bf16.mxu1 %v4162_v14 }
  0xc9   : > { %3251 = vmatmul.mubr.msk.bf16.vlgmr.msra.gmra.mrb[88].mxu0 %vm389_vm2, %v4184_v60  ;;  %3257 = vmatmul.mubr.msk.bf16.vlgmr.msra.gmra.mrb[88].mxu1 %vm389_vm2, %v4185_v4 }
  0xca   : > { %3261 = vmatpush3.bf16.msra.mxu0 %v3747_v32  ;;  %3267 = vmatpush3.bf16.msra.mxu1 %v3752_v0 }
  0xcb   : > { %3262 = vmatprep.mubr.msk.bf16.mxu0 %vm3291_vm0, %v4162_v14  ;;  %3268 = vmatprep.mubr.msk.bf16.mxu1 %vm3291_vm0, %v4162_v14 }
  0xd1   : > { %3263 = vmatmul.mubr.msk.bf16.vlgmr.msra.gmra.mrb[92].mxu0 %vm389_vm2, %v3720_v54  ;;  %3269 = vmatmul.mubr.msk.bf16.vlgmr.msra.gmra.mrb[92].mxu1 %vm389_vm2, %v3731_v27 }
  0xec   : > { %v3978_v5 = vpop.f32.mrb[0].mxu0  ;;  %v3980_v17 = vpop.f32.mrb[0].mxu1 }
  0xed   : > { %v2988_v28 = vpop.f32.mrb[1].mxu0  ;;  %v2994_v51 = vpop.f32.mrb[1].mxu1 }
  0xee   : > { %v434_v53 = vpop.f32.mrb[2].mxu0  ;;  %v480_v48 = vpop.f32.mrb[2].mxu1 }
  0xef   : > { %v2989_v32 = vpop.f32.mrb[3].mxu0  ;;  %v2995_v0 = vpop.f32.mrb[3].mxu1 }
  0xf4   : > { %v3982_v1 = vpop.f32.mrb[4].mxu0  ;;  %v3984_v2 = vpop.f32.mrb[4].mxu1 }
  0xf5   : > { %v3000_v14 = vpop.f32.mrb[5].mxu0  ;;  %v3006_v3 = vpop.f32.mrb[5].mxu1 }
  0xf6   : > { %v526_v54 = vpop.f32.mrb[6].mxu0  ;;  %v572_v6 = vpop.f32.mrb[6].mxu1 }
  0xf7   : > { %v3001_v47 = vpop.f32.mrb[7].mxu0  ;;  %v3007_v27 = vpop.f32.mrb[7].mxu1 }
  0xfc   : > { %v3986_v38 = vpop.f32.mrb[8].mxu0  ;;  %v3988_v21 = vpop.f32.mrb[8].mxu1 }
  0xfd   : > { %v3012_v18 = vpop.f32.mrb[9].mxu0  ;;  %v3018_v15 = vpop.f32.mrb[9].mxu1 }
  0xfe   : > { %v618_v16 = vpop.f32.mrb[10].mxu0  ;;  %v664_v10 = vpop.f32.mrb[10].mxu1 }
  0xff   : > { %v3013_v12 = vpop.f32.mrb[11].mxu0  ;;  %v3019_v23 = vpop.f32.mrb[11].mxu1 }
 0x104   : > { %v3990_v24 = vpop.f32.mrb[12].mxu0  ;;  %v3992_v20 = vpop.f32.mrb[12].mxu1 }
 0x105   : > { %v3024_v22 = vpop.f32.mrb[13].mxu0  ;;  %v3030_v35 = vpop.f32.mrb[13].mxu1 }
 0x106   : > { %v710_v36 = vpop.f32.mrb[14].mxu0  ;;  %v756_v30 = vpop.f32.mrb[14].mxu1 }
 0x107   : > { %v3025_v33 = vpop.f32.mrb[15].mxu0  ;;  %v3031_v45 = vpop.f32.mrb[15].mxu1 }
 0x10c   : > { %v3994_v46 = vpop.f32.mrb[16].mxu0  ;;  %v3996_v42 = vpop.f32.mrb[16].mxu1 }
 0x10d   : > { %v3036_v44 = vpop.f32.mrb[17].mxu0  ;;  %v3042_v49 = vpop.f32.mrb[17].mxu1 }
 0x10e   : > { %v802_v52 = vpop.f32.mrb[18].mxu0  ;;  %v848_v55 = vpop.f32.mrb[18].mxu1 }
 0x10f   : > { %v3037_v57 = vpop.f32.mrb[19].mxu0  ;;  %v3043_v58 = vpop.f32.mrb[19].mxu1 }
 0x114   : > { %v3998_v59 = vpop.f32.mrb[20].mxu0  ;;  %v4000_v61 = vpop.f32.mrb[20].mxu1 }
 0x115   : > { %v3048_v62 = vpop.f32.mrb[21].mxu0  ;;  %v3054_v8 = vpop.f32.mrb[21].mxu1 }
 0x116   : > { %v894_v11 = vpop.f32.mrb[22].mxu0  ;;  %v940_v29 = vpop.f32.mrb[22].mxu1 }
 0x117   : > { %v3049_v31 = vpop.f32.mrb[23].mxu0  ;;  %v3055_v19 = vpop.f32.mrb[23].mxu1 }
 0x11c   : > { %v4002_v34 = vpop.f32.mrb[24].mxu0  ;;  %v4004_v41 = vpop.f32.mrb[24].mxu1 }
 0x11d   : > { %v3060_v43 = vpop.f32.mrb[25].mxu0  ;;  %v3066_v56 = vpop.f32.mrb[25].mxu1 }
 0x11e   : > { %v986_v63 = vpop.f32.mrb[26].mxu0  ;;  %v1032_v7 = vpop.f32.mrb[26].mxu1 }
 0x11f   : > { %v3061_v9 = vpop.f32.mrb[27].mxu0  ;;  %v3067_v13 = vpop.f32.mrb[27].mxu1 }
 0x124   : > { %v4006_v25 = vpop.f32.mrb[28].mxu0  ;;  %v4008_v26 = vpop.f32.mrb[28].mxu1 }
 0x125   : > { %v3072_v37 = vpop.f32.mrb[29].mxu0  ;;  %v3078_v39 = vpop.f32.mrb[29].mxu1 }
 0x126   : > { %v1078_v40 = vpop.f32.mrb[30].mxu0  ;;  %v1124_v50 = vpop.f32.mrb[30].mxu1 }
 0x127   : > { %v3073_v60 = vpop.f32.mrb[31].mxu0  ;;  %v3079_v4 = vpop.f32.mrb[31].mxu1 }
 0x12c   : > { %v1183_v28 = vpop.f32.mrb[32].mxu0  ;;  %v1229_v51 = vpop.f32.mrb[32].mxu1 }
 0x12d   : > { %v1879_v53 = vsub.f32 %v3978_v5, %v1183_v28  ;;  %v1880_v48 = vsub.f32 %v3980_v17, %v1229_v51  ;;  %v3084_v32 = vpop.f32.mrb[33].mxu0  ;;  %v3090_v0 = vpop.f32.mrb[33].mxu1 }
 0x12e   : > { %v1186_v14 = vpop.f32.mrb[34].mxu0  ;;  %v1232_v3 = vpop.f32.mrb[34].mxu1 }
 0x12f   : > { %1895 = vst.msk [vmem:[%s4016_s13] sm:$0xff] %vm389_vm2, %v1879_v53  ;;  %1896 = vst.msk [vmem:[%s4016_s13 + $0x8] sm:$0xff] %vm389_vm2, %v1880_v48  ;;  %v3085_v54 = vpop.f32.mrb[35].mxu0  ;;  %v3091_v6 = vpop.f32.mrb[35].mxu1 }
 0x134   : > { %v1275_v47 = vpop.f32.mrb[36].mxu0  ;;  %v1321_v27 = vpop.f32.mrb[36].mxu1 }
 0x135   : > { %v1881_v18 = vsub.f32 %v3982_v1, %v1275_v47  ;;  %v1882_v15 = vsub.f32 %v3984_v2, %v1321_v27  ;;  %v3096_v16 = vpop.f32.mrb[37].mxu0  ;;  %v3102_v10 = vpop.f32.mrb[37].mxu1 }
 0x136   : > { %v1278_v12 = vpop.f32.mrb[38].mxu0  ;;  %v1324_v23 = vpop.f32.mrb[38].mxu1 }
 0x137   : > { %1897 = vst.msk [vmem:[%s4016_s13 + $0x10] sm:$0xff] %vm389_vm2, %v1881_v18  ;;  %1898 = vst.msk [vmem:[%s4016_s13 + $0x18] sm:$0xff] %vm389_vm2, %v1882_v15  ;;  %v3097_v22 = vpop.f32.mrb[39].mxu0  ;;  %v3103_v35 = vpop.f32.mrb[39].mxu1 }
 0x13c   : > { %v1367_v36 = vpop.f32.mrb[40].mxu0  ;;  %v1413_v30 = vpop.f32.mrb[40].mxu1 }
 0x13d   : > { %v1883_v33 = vsub.f32 %v3986_v38, %v1367_v36  ;;  %v1884_v45 = vsub.f32 %v3988_v21, %v1413_v30  ;;  %v3108_v44 = vpop.f32.mrb[41].mxu0  ;;  %v3114_v49 = vpop.f32.mrb[41].mxu1 }
 0x13e   : > { %v1370_v52 = vpop.f32.mrb[42].mxu0  ;;  %v1416_v55 = vpop.f32.mrb[42].mxu1 }
 0x13f   : > { %1899 = vst.msk [vmem:[%s4016_s13 + $0x20] sm:$0xff] %vm389_vm2, %v1883_v33  ;;  %1900 = vst.msk [vmem:[%s4016_s13 + $0x28] sm:$0xff] %vm389_vm2, %v1884_v45  ;;  %v3109_v57 = vpop.f32.mrb[43].mxu0  ;;  %v3115_v58 = vpop.f32.mrb[43].mxu1 }
 0x144   : > { %v1459_v62 = vpop.f32.mrb[44].mxu0  ;;  %v1505_v8 = vpop.f32.mrb[44].mxu1 }
 0x145   : > { %v1885_v11 = vsub.f32 %v3990_v24, %v1459_v62  ;;  %v1886_v29 = vsub.f32 %v3992_v20, %v1505_v8  ;;  %v3120_v31 = vpop.f32.mrb[45].mxu0  ;;  %v3126_v19 = vpop.f32.mrb[45].mxu1 }
 0x146   : > { %v1462_v43 = vpop.f32.mrb[46].mxu0  ;;  %v1508_v56 = vpop.f32.mrb[46].mxu1 }
 0x147   : > { %1901 = vst.msk [vmem:[%s4016_s13 + $0x30] sm:$0xff] %vm389_vm2, %v1885_v11  ;;  %1902 = vst.msk [vmem:[%s4016_s13 + $0x38] sm:$0xff] %vm389_vm2, %v1886_v29  ;;  %v3121_v63 = vpop.f32.mrb[47].mxu0  ;;  %v3127_v7 = vpop.f32.mrb[47].mxu1 }
 0x14c   : > { %v1551_v9 = vpop.f32.mrb[48].mxu0  ;;  %v1597_v13 = vpop.f32.mrb[48].mxu1 }
 0x14d   : > { %v1887_v37 = vsub.f32 %v3994_v46, %v1551_v9  ;;  %v1888_v39 = vsub.f32 %v3996_v42, %v1597_v13  ;;  %v3132_v40 = vpop.f32.mrb[49].mxu0  ;;  %v3138_v50 = vpop.f32.mrb[49].mxu1 }
 0x14e   : > { %v1554_v60 = vpop.f32.mrb[50].mxu0  ;;  %v1600_v4 = vpop.f32.mrb[50].mxu1 }
 0x14f   : > { %1903 = vst.msk [vmem:[%s4016_s13 + $0x40] sm:$0xff] %vm389_vm2, %v1887_v37  ;;  %1904 = vst.msk [vmem:[%s4016_s13 + $0x48] sm:$0xff] %vm389_vm2, %v1888_v39  ;;  %v3133_v28 = vpop.f32.mrb[51].mxu0  ;;  %v3139_v51 = vpop.f32.mrb[51].mxu1 }
 0x154   : > { %v1643_v53 = vpop.f32.mrb[52].mxu0  ;;  %v1689_v48 = vpop.f32.mrb[52].mxu1 }
 0x155   : > { %v1889_v32 = vsub.f32 %v3998_v59, %v1643_v53  ;;  %v1890_v0 = vsub.f32 %v4000_v61, %v1689_v48  ;;  %v3144_v14 = vpop.f32.mrb[53].mxu0  ;;  %v3150_v3 = vpop.f32.mrb[53].mxu1 }
 0x156   : > { %v1646_v54 = vpop.f32.mrb[54].mxu0  ;;  %v1692_v6 = vpop.f32.mrb[54].mxu1 }
 0x157   : > { %1905 = vst.msk [vmem:[%s4016_s13 + $0x50] sm:$0xff] %vm389_vm2, %v1889_v32  ;;  %1906 = vst.msk [vmem:[%s4016_s13 + $0x58] sm:$0xff] %vm389_vm2, %v1890_v0  ;;  %v3145_v47 = vpop.f32.mrb[55].mxu0  ;;  %v3151_v27 = vpop.f32.mrb[55].mxu1 }
 0x15c   : > { %v1735_v18 = vpop.f32.mrb[56].mxu0  ;;  %v1781_v15 = vpop.f32.mrb[56].mxu1 }
 0x15d   : > { %v1891_v16 = vsub.f32 %v4002_v34, %v1735_v18  ;;  %v1892_v10 = vsub.f32 %v4004_v41, %v1781_v15  ;;  %v3156_v12 = vpop.f32.mrb[57].mxu0  ;;  %v3162_v23 = vpop.f32.mrb[57].mxu1 }
 0x15e   : > { %v1738_v22 = vpop.f32.mrb[58].mxu0  ;;  %v1784_v35 = vpop.f32.mrb[58].mxu1 }
 0x15f   : > { %1907 = vst.msk [vmem:[%s4016_s13 + $0x60] sm:$0xff] %vm389_vm2, %v1891_v16  ;;  %1908 = vst.msk [vmem:[%s4016_s13 + $0x68] sm:$0xff] %vm389_vm2, %v1892_v10  ;;  %v3157_v36 = vpop.f32.mrb[59].mxu0  ;;  %v3163_v30 = vpop.f32.mrb[59].mxu1 }
 0x164   : > { %v1827_v33 = vpop.f32.mrb[60].mxu0  ;;  %v1873_v45 = vpop.f32.mrb[60].mxu1 }
 0x165   : > { %v1893_v44 = vsub.f32 %v4006_v25, %v1827_v33  ;;  %v1894_v49 = vsub.f32 %v4008_v26, %v1873_v45  ;;  %v3168_v52 = vpop.f32.mrb[61].mxu0  ;;  %v3174_v55 = vpop.f32.mrb[61].mxu1 }
 0x166   : > { %v1830_v57 = vpop.f32.mrb[62].mxu0  ;;  %v1876_v58 = vpop.f32.mrb[62].mxu1 }
 0x167   : > { %1909 = vst.msk [vmem:[%s4016_s13 + $0x70] sm:$0xff] %vm389_vm2, %v1893_v44  ;;  %1910 = vst.msk [vmem:[%s4016_s13 + $0x78] sm:$0xff] %vm389_vm2, %v1894_v49  ;;  %v3169_v62 = vpop.f32.mrb[63].mxu0  ;;  %v3175_v8 = vpop.f32.mrb[63].mxu1 }
 0x16c   : > { %v1967_v11 = vpop.f32.mrb[64].mxu0  ;;  %v2013_v29 = vpop.f32.mrb[64].mxu1 }
 0x16d   : > { %v2663_v31 = vadd.f32 %v1967_v11, %v3978_v5  ;;  %v2664_v19 = vadd.f32 %v2013_v29, %v3980_v17  ;;  %v3180_v43 = vpop.f32.mrb[65].mxu0  ;;  %v3186_v56 = vpop.f32.mrb[65].mxu1 }
 0x16e   : > { %v1970_v63 = vpop.f32.mrb[66].mxu0  ;;  %v2016_v7 = vpop.f32.mrb[66].mxu1 }
 0x16f   : > { %2679 = vst.msk [vmem:[%s4071_s16] sm:$0xff] %vm389_vm2, %v2663_v31  ;;  %2680 = vst.msk [vmem:[%s4071_s16 + $0x8] sm:$0xff] %vm389_vm2, %v2664_v19  ;;  %v3181_v9 = vpop.f32.mrb[67].mxu0  ;;  %v3187_v13 = vpop.f32.mrb[67].mxu1 }
 0x174   : > { %v2059_v37 = vpop.f32.mrb[68].mxu0  ;;  %v2105_v39 = vpop.f32.mrb[68].mxu1 }
 0x175   : > { %v2665_v40 = vadd.f32 %v2059_v37, %v3982_v1  ;;  %v2666_v5 = vadd.f32 %v2105_v39, %v3984_v2  ;;  %v3192_v50 = vpop.f32.mrb[69].mxu0  ;;  %v3198_v17 = vpop.f32.mrb[69].mxu1 }
 0x176   : > { %v2062_v60 = vpop.f32.mrb[70].mxu0  ;;  %v2108_v4 = vpop.f32.mrb[70].mxu1 }
 0x177   : > { %2681 = vst.msk [vmem:[%s4071_s16 + $0x10] sm:$0xff] %vm389_vm2, %v2665_v40  ;;  %2682 = vst.msk [vmem:[%s4071_s16 + $0x18] sm:$0xff] %vm389_vm2, %v2666_v5  ;;  %v3193_v28 = vpop.f32.mrb[71].mxu0  ;;  %v3199_v51 = vpop.f32.mrb[71].mxu1 }
 0x17c   : > { %v2151_v53 = vpop.f32.mrb[72].mxu0  ;;  %v2197_v48 = vpop.f32.mrb[72].mxu1 }
 0x17d   : > { %v2667_v32 = vadd.f32 %v2151_v53, %v3986_v38  ;;  %v2668_v1 = vadd.f32 %v2197_v48, %v3988_v21  ;;  %v3204_v0 = vpop.f32.mrb[73].mxu0  ;;  %v3210_v2 = vpop.f32.mrb[73].mxu1 }
 0x17e   : > { %v2154_v14 = vpop.f32.mrb[74].mxu0  ;;  %v2200_v3 = vpop.f32.mrb[74].mxu1 }
 0x17f   : > { %2683 = vst.msk [vmem:[%s4071_s16 + $0x20] sm:$0xff] %vm389_vm2, %v2667_v32  ;;  %2684 = vst.msk [vmem:[%s4071_s16 + $0x28] sm:$0xff] %vm389_vm2, %v2668_v1  ;;  %v3205_v54 = vpop.f32.mrb[75].mxu0  ;;  %v3211_v6 = vpop.f32.mrb[75].mxu1 }
 0x184   : > { %v2243_v47 = vpop.f32.mrb[76].mxu0  ;;  %v2289_v27 = vpop.f32.mrb[76].mxu1 }
 0x185   : > { %v2669_v18 = vadd.f32 %v2243_v47, %v3990_v24  ;;  %v2670_v38 = vadd.f32 %v2289_v27, %v3992_v20  ;;  %v3216_v15 = vpop.f32.mrb[77].mxu0  ;;  %v3222_v21 = vpop.f32.mrb[77].mxu1 }
 0x186   : > { %v2246_v16 = vpop.f32.mrb[78].mxu0  ;;  %v2292_v10 = vpop.f32.mrb[78].mxu1 }
 0x187   : > { %2685 = vst.msk [vmem:[%s4071_s16 + $0x30] sm:$0xff] %vm389_vm2, %v2669_v18  ;;  %2686 = vst.msk [vmem:[%s4071_s16 + $0x38] sm:$0xff] %vm389_vm2, %v2670_v38  ;;  %v3217_v12 = vpop.f32.mrb[79].mxu0  ;;  %v3223_v23 = vpop.f32.mrb[79].mxu1 }
 0x18c   : > { %v2335_v22 = vpop.f32.mrb[80].mxu0  ;;  %v2381_v35 = vpop.f32.mrb[80].mxu1 }
 0x18d   : > { %v2671_v36 = vadd.f32 %v2335_v22, %v3994_v46  ;;  %v2672_v24 = vadd.f32 %v2381_v35, %v3996_v42  ;;  %v3228_v30 = vpop.f32.mrb[81].mxu0  ;;  %v3234_v20 = vpop.f32.mrb[81].mxu1 }
 0x18e   : > { %v2338_v33 = vpop.f32.mrb[82].mxu0  ;;  %v2384_v45 = vpop.f32.mrb[82].mxu1 }
 0x18f   : > { %2687 = vst.msk [vmem:[%s4071_s16 + $0x40] sm:$0xff] %vm389_vm2, %v2671_v36  ;;  %2688 = vst.msk [vmem:[%s4071_s16 + $0x48] sm:$0xff] %vm389_vm2, %v2672_v24  ;;  %v3229_v44 = vpop.f32.mrb[83].mxu0  ;;  %v3235_v49 = vpop.f32.mrb[83].mxu1 }
 0x194   : > { %v2427_v52 = vpop.f32.mrb[84].mxu0  ;;  %v2473_v55 = vpop.f32.mrb[84].mxu1 }
 0x195   : > { %v2673_v57 = vadd.f32 %v2427_v52, %v3998_v59  ;;  %v2674_v46 = vadd.f32 %v2473_v55, %v4000_v61  ;;  %v3240_v58 = vpop.f32.mrb[85].mxu0  ;;  %v3246_v42 = vpop.f32.mrb[85].mxu1 }
 0x196   : > { %v2430_v62 = vpop.f32.mrb[86].mxu0  ;;  %v2476_v8 = vpop.f32.mrb[86].mxu1 }
 0x197   : > { %2689 = vst.msk [vmem:[%s4071_s16 + $0x50] sm:$0xff] %vm389_vm2, %v2673_v57  ;;  %2690 = vst.msk [vmem:[%s4071_s16 + $0x58] sm:$0xff] %vm389_vm2, %v2674_v46  ;;  %v3241_v11 = vpop.f32.mrb[87].mxu0  ;;  %v3247_v29 = vpop.f32.mrb[87].mxu1 }
 0x19c   : > { %v2519_v31 = vpop.f32.mrb[88].mxu0  ;;  %v2565_v19 = vpop.f32.mrb[88].mxu1 }
 0x19d   : > { %v2675_v43 = vadd.f32 %v2519_v31, %v4002_v34  ;;  %v2676_v59 = vadd.f32 %v2565_v19, %v4004_v41  ;;  %v3252_v56 = vpop.f32.mrb[89].mxu0  ;;  %v3258_v61 = vpop.f32.mrb[89].mxu1 }
 0x19e   : > { %v2522_v63 = vpop.f32.mrb[90].mxu0  ;;  %v2568_v7 = vpop.f32.mrb[90].mxu1 }
 0x19f   : > { %2691 = vst.msk [vmem:[%s4071_s16 + $0x60] sm:$0xff] %vm389_vm2, %v2675_v43  ;;  %2692 = vst.msk [vmem:[%s4071_s16 + $0x68] sm:$0xff] %vm389_vm2, %v2676_v59  ;;  %v3253_v9 = vpop.f32.mrb[91].mxu0  ;;  %v3259_v13 = vpop.f32.mrb[91].mxu1 }
 0x1a4   : > { %v2611_v37 = vpop.f32.mrb[92].mxu0  ;;  %v2657_v39 = vpop.f32.mrb[92].mxu1 }
 0x1a5   : > { %v2677_v40 = vadd.f32 %v2611_v37, %v4006_v25  ;;  %v2678_v34 = vadd.f32 %v2657_v39, %v4008_v26  ;;  %v3264_v5 = vpop.f32.mrb[93].mxu0  ;;  %v3270_v41 = vpop.f32.mrb[93].mxu1 }
 0x1a6   : > { %v2614_v50 = vpop.f32.mrb[94].mxu0  ;;  %v2660_v17 = vpop.f32.mrb[94].mxu1 }
 0x1a7   : > { %2693 = vst.msk [vmem:[%s4071_s16 + $0x70] sm:$0xff] %vm389_vm2, %v2677_v40  ;;  %2694 = vst.msk [vmem:[%s4071_s16 + $0x78] sm:$0xff] %vm389_vm2, %v2678_v34  ;;  %v3265_v60 = vpop.f32.mrb[95].mxu0  ;;  %v3271_v4 = vpop.f32.mrb[95].mxu1 }
 0x1a8 PF: > { %s16_s18 = sadd.s32 1, %s3288_s18  }
 0x1a9   : > { %p13_p4 = scmp.ge.s32.totalorder %s16_s18, 4  }
 0x1ab   :  { %15 = sbr.rel (!%p13_p4) target bundleno = 1 (0x1), region = 87 }

</bundles_post_ra>
